<compile_context>
chip_gen: v7x
topology: tpu7x:2x2x1
jax: 0.10.0
libtpu: 0.0.40
codegen_flags: <defaults>
</compile_context>

<pallas_src>
import jax
import jax.numpy as jnp
from jax import lax
from jax.experimental import pallas as pl
from jax.experimental.pallas import tpu as pltpu

_L2NORM_EPS = 1e-12  # F.normalize default eps
_EPS_SQ = _L2NORM_EPS * _L2NORM_EPS


def _round_up(n, m):
    return ((n + m - 1) // m) * m


def _vmem_capacity_bytes():
    """Physical VMEM of the attached TPU; conservative 64 MiB fallback (v7x-safe)."""
    try:
        return int(pltpu.get_tpu_info().vmem_capacity_bytes)
    except Exception:
        return 64 << 20


# ----------------------------- kernels --------------------------------------

def _finish(x_f32, y_f32, s_f32, o_ref):
    """l2norm(y); l2norm(x.lerp(y_n, s)); store."""
    inv_y = lax.rsqrt(jnp.maximum(jnp.sum(y_f32 * y_f32, axis=-1, keepdims=True), _EPS_SQ))
    y_n = y_f32 * inv_y
    z = x_f32 + s_f32 * (y_n - x_f32)
    inv_z = lax.rsqrt(jnp.maximum(jnp.sum(z * z, axis=-1, keepdims=True), _EPS_SQ))
    o_ref[...] = (z * inv_z).astype(o_ref.dtype)


def _residual_kernel(x_ref, w_ref, scale_ref, o_ref):
    # x_ref: (rb, D) rows; w_ref: (D, D) bf16 resident; scale_ref: (1, D) f32; o_ref: (rb, D)
    x_in = x_ref[...]
    # fn(x): cast directly from the input dtype to bf16 for the MXU (no f32 round trip).
    y = jnp.dot(x_in.astype(jnp.bfloat16), w_ref[...], preferred_element_type=jnp.float32)
    _finish(x_in.astype(jnp.float32), y, scale_ref[...], o_ref)


def _residual_kernel_ktiled(xk_ref, w_ref, x_ref, scale_ref, o_ref, acc_ref):
    # Grid = (row blocks, K blocks); K is the reduction ("arbitrary", last).
    # xk_ref: (rb, tk) slab of x for the matmul; w_ref: (tk, D) bf16 weight slab;
    # x_ref: (rb, D) full residual rows (only read at finalize); acc_ref: (rb, D) f32 scratch.
    k = pl.program_id(1)

    @pl.when(k == 0)
    def _():
        acc_ref[...] = jnp.zeros_like(acc_ref)

    acc_ref[...] += jnp.dot(xk_ref[...].astype(jnp.bfloat16), w_ref[...],
                            preferred_element_type=jnp.float32)

    @pl.when(k == pl.num_programs(1) - 1)
    def _():
        _finish(x_ref[...].astype(jnp.float32), acc_ref[...], scale_ref[...], o_ref)


# --------------------------- tiling heuristics -------------------------------

def _choose_rows_blk(n_rows, per_row_bytes, fixed_bytes, budget_bytes, *, max_rows=4096):
    """Largest sublane-aligned row tile fitting the VMEM budget, capped so that
    large problems keep >= 2 row blocks (v7x megacore sharding of the 'parallel' axis)."""
    avail = max(budget_bytes - fixed_bytes, per_row_bytes * 8)
    rb = min(max_rows, max(8, avail // per_row_bytes))
    if n_rows >= 1024:
        rb = min(rb, _round_up(pl.cdiv(n_rows, 2), 8))
    rb = max(8, (rb // 8) * 8)
    rb = min(rb, _round_up(n_rows, 8))
    return int(rb)


def _choose_k_blk(d, budget_bytes):
    """Largest lane-aligned divisor of d whose double-buffered (tk, d) bf16 weight
    slab stays within ~1/4 of the VMEM budget. None if d is not lane-aligned."""
    if d % 128 != 0:
        return None
    best = None
    t = 128
    while t <= d:
        if d % t == 0 and 2 * t * d * 2 <= max(budget_bytes // 4, 2 * 128 * d * 2):
            best = t
        t += 128
    return best


# ------------------------------- wrapper -------------------------------------

def residual_forward(x, w, scale_param, *, init, scale,
                     rows_blk=None, k_blk=None, force_k_tiling=False):
    """x: (B, S, D); w: (D, D) applied as x @ w (i.e. pass torch_linear.weight.T);
    scale_param: (D,). Output dtype == x.dtype (pass bf16 x for bf16 IO)."""
    B, S, D = x.shape
    N = B * S
    x2 = x.reshape(N, D)

    # Fold Scale.forward()'s (init / scale) factor into the parameter once.
    scale2 = (scale_param.astype(jnp.float32) * (init / scale)).reshape(1, D)
    w_bf16 = w.astype(jnp.bfloat16)

    in_it = jnp.dtype(x.dtype).itemsize
    out_it = in_it

    vmem_cap = _vmem_capacity_bytes()
    budget = (vmem_cap * 3) // 4          # ~96 MiB on v5e/v6e, ~48 MiB on v7x

    weight_resident = D * D * 2           # single-buffered bf16 weight
    use_k = force_k_tiling or (D % 128 == 0 and weight_resident > budget // 2)
    tk = None
    if use_k:
        tk = k_blk if k_blk is not None else _choose_k_blk(D, budget)
        if tk is None or D % tk != 0:
            use_k = False

    if not use_k:
        # -------- full-resident-weight path (small / medium D) --------------
        per_row = 2 * D * in_it + 2 * D * out_it + 4 * D * 4   # dbuf IO + f32 temps
        fixed = weight_resident + 2 * D * 4
        rb = rows_blk if rows_blk is not None else _choose_rows_blk(N, per_row, fixed, budget)
        est = rb * per_row + fixed
        vmem_limit = int(min(vmem_cap - (4 << 20), max(32 << 20, est + (4 << 20))))

        out2 = pl.pallas_call(
            _residual_kernel,
            out_shape=jax.ShapeDtypeStruct((N, D), x.dtype),
            grid_spec=pltpu.PrefetchScalarGridSpec(
                num_scalar_prefetch=0,
                grid=(pl.cdiv(N, rb),),            # partial last block handled by Pallas masking
                in_specs=[
                    pl.BlockSpec((rb, D), lambda i: (i, 0)),                # x rows
                    pl.BlockSpec((D, D), lambda i: (0, 0),
                                 pipeline_mode=pl.Buffered(1)),             # resident weight, single-buffered
                    pl.BlockSpec((1, D), lambda i: (0, 0),
                                 pipeline_mode=pl.Buffered(1)),             # resident scale
                ],
                out_specs=pl.BlockSpec((rb, D), lambda i: (i, 0)),
            ),
            compiler_params=pltpu.CompilerParams(
                dimension_semantics=("parallel",),  # shardable across TCs on v7x
                vmem_limit_bytes=vmem_limit,
            ),
        )(x2, w_bf16, scale2)
    else:
        # -------- K-tiled path: weight streamed in (tk, D) slabs (large D) ---
        per_row = 2 * tk * in_it + 2 * D * in_it + 2 * D * out_it + 4 * D * 4
        fixed = 2 * tk * D * 2 + 2 * D * 4
        rb = rows_blk if rows_blk is not None else _choose_rows_blk(N, per_row, fixed, budget)
        est = rb * per_row + fixed
        vmem_limit = int(min(vmem_cap - (4 << 20), max(32 << 20, est + (4 << 20))))

        out2 = pl.pallas_call(
            _residual_kernel_ktiled,
            out_shape=jax.ShapeDtypeStruct((N, D), x.dtype),
            grid_spec=pltpu.PrefetchScalarGridSpec(
                num_scalar_prefetch=0,
                grid=(pl.cdiv(N, rb), D // tk),
                in_specs=[
                    pl.BlockSpec((rb, tk), lambda i, k: (i, k)),   # x K-slab for the matmul
                    pl.BlockSpec((tk, D), lambda i, k: (k, 0)),    # weight K-slab (streamed)
                    pl.BlockSpec((rb, D), lambda i, k: (i, 0)),    # full residual rows (finalize)
                    pl.BlockSpec((1, D), lambda i, k: (0, 0),
                                 pipeline_mode=pl.Buffered(1)),    # resident scale
                ],
                out_specs=pl.BlockSpec((rb, D), lambda i, k: (i, 0)),
                scratch_shapes=[pltpu.VMEM((rb, D), jnp.float32)],
            ),
            compiler_params=pltpu.CompilerParams(
                dimension_semantics=("parallel", "arbitrary"),
                vmem_limit_bytes=vmem_limit,
            ),
        )(x2, w_bf16, x2, scale2)

    return out2.reshape(B, S, D)


# ------------------------------ reference ------------------------------------

def residual_reference(x, w, scale_param, *, init, scale, matmul_dtype=jnp.float32):
    """Pure-JAX reference matching the PyTorch module semantics.
    Set matmul_dtype=jnp.bfloat16 to match the kernel's MXU precision exactly."""
    def l2norm(t):
        inv = lax.rsqrt(jnp.maximum(jnp.sum(t * t, axis=-1, keepdims=True), _EPS_SQ))
        return t * inv

    branch_scale = scale_param * (init / scale)            # Scale.forward()
    out = jnp.einsum("bsd,de->bse",
                     x.astype(matmul_dtype), w.astype(matmul_dtype),
                     preferred_element_type=jnp.float32)   # fn(x)
    out = l2norm(out)
    out = l2norm(x + branch_scale * (out - x))             # lerp + l2norm
    return out.astype(x.dtype)


if __name__ == "__main__":
    key = jax.random.PRNGKey(0)

    def run_case(B, S, D, *, force_k_tiling=False, k_blk=None, rows_blk=None, seed_off=0):
        kx, kw = jax.random.split(jax.random.fold_in(key, seed_off))
        init = 1.0
        scale = D ** -0.5                                   # default(scale, dim ** -0.5)
        x = jax.random.normal(kx, (B, S, D), dtype=jnp.float32)
        w = jax.random.normal(kw, (D, D), dtype=jnp.float32) / jnp.sqrt(D)
        scale_param = jnp.ones((D,), dtype=jnp.float32) * scale   # torch.ones(dim) * scale

        out = residual_forward(x, w, scale_param, init=init, scale=scale,
                               rows_blk=rows_blk, k_blk=k_blk,
                               force_k_tiling=force_k_tiling)
        out = jax.block_until_ready(out)
        assert out.shape == (B, S, D)
        assert bool(jnp.all(jnp.isfinite(out)))

        # Matched-precision check (bf16 matmul, like the kernel): tight tolerance.
        ref_bf16 = residual_reference(x, w, scale_param, init=init, scale=scale,
                                      matmul_dtype=jnp.bfloat16)
        assert jnp.allclose(out, ref_bf16, atol=1e-4, rtol=1e-4), \
            f"mismatch vs matched ref (B={B}, S={S}, D={D}, ktiled={force_k_tiling})"

        # Full-f32 module semantics: loose tolerance (only fn()'s matmul runs in bf16).
        ref_f32 = residual_reference(x, w, scale_param, init=init, scale=scale)
        assert jnp.allclose(out, ref_f32, atol=2e-2, rtol=2e-2), \
            f"mismatch vs f32 ref (B={B}, S={S}, D={D}, ktiled={force_k_tiling})"

    # 1) default resident-weight path, lane-dense D.
    run_case(2, 8, 128)
    # 2) ragged row count with a small forced row block -> exercises the masked
    #    partial last block (no pad/slice HBM round trips).
    run_case(3, 5, 128, rows_blk=8, seed_off=1)
    # 3) K-tiled path with 2 K-steps -> exercises the streamed-weight accumulator variant.
    run_case(2, 8, 256, force_k_tiling=True, k_blk=128, seed_off=2)

    print("KERNEL_OK")
</pallas_src>

<mosaic_0001>
module attributes {stable_mosaic.version = 11 : i64} {
  func.func @_residual_kernel(%arg0: i32, %arg1: memref<16x128xf32, #tpu.memory_space<vmem>>, %arg2: memref<128x128xbf16, #tpu.memory_space<vmem>>, %arg3: memref<1x128xf32, #tpu.memory_space<vmem>>, %arg4: memref<16x128xf32, #tpu.memory_space<vmem>>) attributes {dimension_semantics = [#tpu.dimension_semantics<parallel>], iteration_bounds = array<i64: 1>, scalar_prefetch = 0 : i64, scratch_operands = 0 : i64, tpu.core_type = #tpu.core_type<tc>, window_params = [{transform_indices = @transform_0, window_bounds = array<i64: 16, 128>}, {pipeline_mode = #tpu.pipeline_mode<synchronous>, transform_indices = @transform_1, window_bounds = array<i64: 128, 128>}, {pipeline_mode = #tpu.pipeline_mode<synchronous>, transform_indices = @transform_2, window_bounds = array<i64: 1, 128>}, {transform_indices = @transform_3, window_bounds = array<i64: 16, 128>}]} {
    %c0 = arith.constant 0 : index
    %c0_0 = arith.constant 0 : index
    %0 = vector.load %arg1[%c0, %c0_0] : memref<16x128xf32, #tpu.memory_space<vmem>>, vector<16x128xf32>
    %1 = arith.truncf %0 : vector<16x128xf32> to vector<16x128xbf16>
    %c0_1 = arith.constant 0 : index
    %c0_2 = arith.constant 0 : index
    %2 = vector.load %arg2[%c0_1, %c0_2] : memref<128x128xbf16, #tpu.memory_space<vmem>>, vector<128x128xbf16>
    %cst = arith.constant dense<0.000000e+00> : vector<16x128xf32>
    %3 = tpu.matmul %1, %2, %cst {dimension_numbers = #tpu.dot_dimension_numbers<[1], [0], [0], [1], [0, 0, 1, 1], [], []>} : vector<16x128xbf16>, vector<128x128xbf16>, vector<16x128xf32> -> vector<16x128xf32>
    %c0_3 = arith.constant 0 : index
    %c0_4 = arith.constant 0 : index
    %4 = vector.load %arg3[%c0_3, %c0_4] : memref<1x128xf32, #tpu.memory_space<vmem>>, vector<1x128xf32>
    %5 = arith.mulf %3, %3 : vector<16x128xf32>
    %cst_5 = arith.constant dense<0.000000e+00> : vector<16xf32>
    %6 = vector.multi_reduction <add>, %5, %cst_5 [1] : vector<16x128xf32> to vector<16xf32>
    %7 = vector.shape_cast %6 : vector<16xf32> to vector<16x1xf32>
    %cst_6 = arith.constant 1.000000e-24 : f32
    %8 = vector.broadcast %cst_6 : f32 to vector<16x1xf32>
    %9 = arith.maximumf %7, %8 : vector<16x1xf32>
    %10 = math.rsqrt %9 : vector<16x1xf32>
    %11 = vector.broadcast %10 : vector<16x1xf32> to vector<16x128xf32>
    %12 = arith.mulf %3, %11 : vector<16x128xf32>
    %13 = arith.subf %12, %0 : vector<16x128xf32>
    %14 = vector.broadcast %4 : vector<1x128xf32> to vector<16x128xf32>
    %15 = arith.mulf %14, %13 : vector<16x128xf32>
    %16 = arith.addf %0, %15 : vector<16x128xf32>
    %17 = arith.mulf %16, %16 : vector<16x128xf32>
    %cst_7 = arith.constant dense<0.000000e+00> : vector<16xf32>
    %18 = vector.multi_reduction <add>, %17, %cst_7 [1] : vector<16x128xf32> to vector<16xf32>
    %19 = vector.shape_cast %18 : vector<16xf32> to vector<16x1xf32>
    %cst_8 = arith.constant 1.000000e-24 : f32
    %20 = vector.broadcast %cst_8 : f32 to vector<16x1xf32>
    %21 = arith.maximumf %19, %20 : vector<16x1xf32>
    %22 = math.rsqrt %21 : vector<16x1xf32>
    %23 = vector.broadcast %22 : vector<16x1xf32> to vector<16x128xf32>
    %24 = arith.mulf %16, %23 : vector<16x128xf32>
    %c0_9 = arith.constant 0 : index
    %c0_10 = arith.constant 0 : index
    %25 = vector.load %arg4[%c0_9, %c0_10] : memref<16x128xf32, #tpu.memory_space<vmem>>, vector<16x128xf32>
    tpu.vector_store %arg4[%c0_9, %c0_10], %24 {strides = array<i32>} : memref<16x128xf32, #tpu.memory_space<vmem>>, vector<16x128xf32>,
    return
  }
  func.func @transform_0(%arg0: i32) -> (i32, i32) {
    %c0_i32 = arith.constant 0 : i32
    %c0_i32_0 = arith.constant 0 : i32
    return %arg0, %c0_i32 : i32, i32
  }
  func.func @transform_1(%arg0: i32) -> (i32, i32) {
    %c0_i32 = arith.constant 0 : i32
    %c0_i32_0 = arith.constant 0 : i32
    %c0_i32_1 = arith.constant 0 : i32
    return %c0_i32, %c0_i32_0 : i32, i32
  }
  func.func @transform_2(%arg0: i32) -> (i32, i32) {
    %c0_i32 = arith.constant 0 : i32
    %c0_i32_0 = arith.constant 0 : i32
    %c0_i32_1 = arith.constant 0 : i32
    return %c0_i32, %c0_i32_0 : i32, i32
  }
  func.func @transform_3(%arg0: i32) -> (i32, i32) {
    %c0_i32 = arith.constant 0 : i32
    %c0_i32_0 = arith.constant 0 : i32
    return %arg0, %c0_i32 : i32, i32
  }
}

</mosaic_0001>

<bundles_post_ra>
// kernel: tpu_custom_call.1
= control target key start
LH: loop header
LB: loop body
LE: loop exit
PB: predicated region body
PF: predicated region fallthrough
CT: control target
= control target key end

     0   :  { %8 = vsyncpa [#allocation3], 0  ;;  %s418_s0 = inlined_call_operand.hbm [shape: f32[16,128], index: 0, kind: input, shape index: {}]   ;;  %s419_s1 = inlined_call_operand.hbm [shape: bf16[128,128], index: 1, kind: input, shape index: {}]   ;;  %s420_s2 = inlined_call_operand.vmem [shape: f32[1,128], index: 2, kind: input, shape index: {}]   ;;  %s421_s3 = inlined_call_operand.hbm [shape: f32[16,128], index: 3, kind: output, shape index: {}]  }
   0x1   :  { %9 = vsyncpa [#allocation6], 0 }
   0x2   :  { %10 = vsyncpa [#allocation4], 0  ;;  %s344_s12 = smov [#allocation2]   ;;  %s272_s16 = scalar_lea.hbm %s418_s0, 256 }
   0x3   :  { %s16_s13 = sshll.u32 %s344_s12, 4  ;;  %p273_p0 = scmp.ne.s32.totalorder %s418_s0, %s272_s16  ;;  %s17_s13 = int_to_ptr.vmem [resolvable:$true] %s16_s13 }
   0x4   :  { %p276_p1 = scmp.lt.u32.totalorder %s272_s16, %s418_s0 }
   0x6   :  { %p278_p2 = pnand %p276_p1, %p273_p0 }
   0x8   :  { %281 = shalt.err (!%p278_p2)
}
   0x9   :  { %s282_s21 = scalar_lea.vmem %s17_s13, 256  ;;  %p287_p4 = scmp.lt.s32.totalorder %s17_s13, %s17_s13 }
   0xa   :  { %p283_p3 = scmp.ne.s32.totalorder %s17_s13, %s282_s21  ;;  %p288_p5 = scmp.lt.s32.totalorder %s282_s21, %s282_s21 }
   0xc   :  { %p289_p6 = por %p288_p5, %p287_p4 }
   0xe   :  { %p290_p7 = pnand %p289_p6, %p283_p3 }
  0x10   :  { %293 = shalt.err (!%p290_p7)
}
  0x11   :  { %s345_s22 = smov 128   ;;  %s346_s23 = smov 8  }
  0x12   :  { %22 = dma.hbm_to_vmem [thread:$0]  %s418_s0, 256, %s17_s13, [#allocation3], %s345_s22, %s345_s22, %s346_s23  }
  0x13   :  { %s347_s26 = smov [#allocation5]   ;;  %s294_s30 = scalar_lea.hbm %s419_s1, 1024 }
  0x14   :  { %s28_s27 = sshll.u32 %s347_s26, 4  ;;  %p295_p8 = scmp.ne.s32.totalorder %s419_s1, %s294_s30  ;;  %s29_s27 = int_to_ptr.vmem [resolvable:$true] %s28_s27 }
  0x15   :  { %p298_p9 = scmp.lt.u32.totalorder %s294_s30, %s419_s1 }
  0x17   :  { %p300_p10 = pnand %p298_p9, %p295_p8 }
  0x19   :  { %303 = shalt.err (!%p300_p10)
}
  0x1a   :  { %s304_s8 = scalar_lea.vmem %s29_s27, 1024  ;;  %p309_p12 = scmp.lt.s32.totalorder %s29_s27, %s29_s27 }
  0x1b   :  { %p305_p11 = scmp.ne.s32.totalorder %s29_s27, %s304_s8  ;;  %p310_p13 = scmp.lt.s32.totalorder %s304_s8, %s304_s8 }
  0x1d   :  { %p311_p0 = por %p310_p13, %p309_p12 }
  0x1f   :  { %p312_p1 = pnand %p311_p0, %p305_p11 }
  0x21   :  { %315 = shalt.err (!%p312_p1)
}
  0x22   :  { %s348_s0 = smov 64   ;;  %s349_s9 = smov 4  }
  0x23   :  { %34 = dma.hbm_to_vmem [thread:$0]  %s419_s1, 1024, %s29_s27, [#allocation6], %s348_s0, %s348_s0, %s349_s9  }
  0x24   :  { %338 = dma.done.wait [#allocation3], 256  }
  0x25   :  { %339 = vsyncadd [#allocation3], 4294967040 }
  0x26   :  { %340 = dma.done.wait [#allocation6], 1024  }
  0x27   :  { %341 = vsyncadd [#allocation6], 4294966272  ;;  %v350_v0 = vmov 0.0   ;;  %vm351_vm0 = vmmov 0   ;;  %v256_v1 = vld [vmem:[#allocation5] sm:$0xff]   ;;  %v257_v2 = vld [vmem:[#allocation5 + $0x8] sm:$0xff]  }
  0x28   :  { %227 = vmatprep.subr.bf16.mxu0 %v350_v0  ;;  %243 = vmatprep.mubr.msk.bf16.mxu0 %vm351_vm0, %v350_v0  ;;  %v258_v3 = vld [vmem:[#allocation5 + $0x10] sm:$0xff]   ;;  %v259_v4 = vld [vmem:[#allocation5 + $0x18] sm:$0xff]   ;;  %v260_v5 = vld [vmem:[#allocation5 + $0x20] sm:$0xff]  }
  0x29   :  { %228 = vmatpush3.bf16.msra.mxu0 %v256_v1  ;;  %v261_v6 = vld [vmem:[#allocation5 + $0x28] sm:$0xff]   ;;  %v262_v7 = vld [vmem:[#allocation5 + $0x30] sm:$0xff]   ;;  %v263_v8 = vld [vmem:[#allocation5 + $0x38] sm:$0xff]  }
  0x2a   :  { %229 = vmatprep.subr.bf16.mxu0 %v350_v0  ;;  %v44_v9 = vld [vmem:[#allocation2] sm:$0xff]  ;;  %v45_v10 = vld [vmem:[#allocation2 + $0x8] sm:$0xff] }
  0x2b   :  { %v46_v11 = vpack.c.bf16 %v45_v10, %v44_v9  ;;  %v217_v24 = vld [vmem:[%s420_s2] ss:$0 sm:$0xff]  ;;  %s352_s2 = smov [#allocation7]  }
  0x2c   :  { %s196_s13 = sshll.u32 %s352_s2, 4  ;;  %s197_s13 = int_to_ptr.vmem [resolvable:$true] %s196_s13 }
  0x2d   :  { %230 = vmatpush3.bf16.msra.mxu0 %v257_v2  ;;  %s316_s14 = scalar_lea.vmem %s197_s13, 256  ;;  %p321_p3 = scmp.lt.s32.totalorder %s197_s13, %s197_s13 }
  0x2e   :  { %231 = vmatprep.subr.bf16.mxu0 %v350_v0  ;;  %p317_p2 = scmp.ne.s32.totalorder %s197_s13, %s316_s14  ;;  %p322_p4 = scmp.lt.s32.totalorder %s316_s14, %s316_s14 }
  0x30   :  { %p323_p5 = por %p322_p4, %p321_p3 }
  0x31   :  { %232 = vmatpush3.bf16.msra.mxu0 %v258_v3 }
  0x32   :  { %233 = vmatprep.subr.bf16.mxu0 %v350_v0  ;;  %p324_p6 = pnand %p323_p5, %p317_p2 }
  0x35   :  { %234 = vmatpush3.bf16.msra.mxu0 %v259_v4 }
  0x36   :  { %235 = vmatprep.subr.bf16.mxu0 %v350_v0 }
  0x39   :  { %236 = vmatpush3.bf16.msra.mxu0 %v260_v5 }
  0x3a   :  { %237 = vmatprep.subr.bf16.mxu0 %v350_v0 }
  0x3d   :  { %238 = vmatpush3.bf16.msra.mxu0 %v261_v6 }
  0x3e   :  { %239 = vmatprep.subr.bf16.mxu0 %v350_v0 }
  0x41   :  { %240 = vmatpush3.bf16.msra.mxu0 %v262_v7 }
  0x42   :  { %241 = vmatprep.subr.bf16.mxu0 %v350_v0 }
  0x45   :  { %242 = vmatpush3.bf16.msra.mxu0 %v263_v8 }
  0x48   :  { %244 = vmatmul.mubr.bf16.vlgmr.msra.gmra.mrb[0].mxu0 %v46_v11 }
 0x11b   :  { %v145_v12 = vpop.f32.mrb[0].mxu0 }
 0x11c   :  { %v245_v13 = vpop.f32.mrb[1].mxu0  ;;  %v153_v14 = vmul.f32 %v145_v12, %v145_v12 }
 0x11d   :  { %v148_v15 = vpop.f32.mrb[2].mxu0 }
 0x11e   :  { %155 = vadd.xlane.f32.xlu0 %v153_v14  ;;  %v246_v16 = vpop.f32.mrb[3].mxu0  ;;  %v154_v17 = vmul.f32 %v148_v15, %v148_v15 }
 0x122   :  { %157 = vadd.xlane.f32.xlu0 %v154_v17 }
 0x1ab   :  { %v156_v18 = vpop.xlane.xlu0 %155 }
 0x1ac   :  { %v159_v19 = vmax.f32 %v156_v18, 1e-24 }
 0x1ae   :  { %264 = vrsqrt.f32 %v159_v19 }
 0x1af   :  { %v158_v20 = vpop.xlane.xlu0 %157 }
 0x1b0   :  { %v160_v21 = vmax.f32 %v158_v20, 1e-24 }
 0x1b2   :  { %266 = vrsqrt.f32 %v160_v21 }
 0x1b8   :  { %v265_v22 = vpop.eup %264 }
 0x1b9   :  { %v163_v23 = vmul.f32 %v265_v22, %v145_v12 }
 0x1bb   :  { %v165_v25 = vsub.f32 %v163_v23, %v44_v9 }
 0x1bc   :  { %v267_v26 = vpop.eup %266 }
 0x1bd   :  { %v173_v27 = vmul.f32 %v217_v24, %v165_v25  ;;  %v164_v28 = vmul.f32 %v267_v26, %v148_v15 }
 0x1bf   :  { %v175_v29 = vadd.f32 %v173_v27, %v44_v9  ;;  %v166_v30 = vsub.f32 %v164_v28, %v45_v10 }
 0x1c1   :  { %v177_v31 = vmul.f32 %v175_v29, %v175_v29  ;;  %v174_v32 = vmul.f32 %v217_v24, %v166_v30 }
 0x1c3   :  { %179 = vadd.xlane.f32.xlu1 %v177_v31  ;;  %v176_v33 = vadd.f32 %v174_v32, %v45_v10 }
 0x1c5   :  { %v178_v34 = vmul.f32 %v176_v33, %v176_v33 }
 0x1c7   :  { %181 = vadd.xlane.f32.xlu1 %v178_v34 }
 0x250   :  { %v180_v35 = vpop.xlane.xlu1 %179 }
 0x251   :  { %v183_v36 = vmax.f32 %v180_v35, 1e-24 }
 0x253   :  { %268 = vrsqrt.f32 %v183_v36 }
 0x254   :  { %v182_v37 = vpop.xlane.xlu1 %181 }
 0x255   :  { %v184_v38 = vmax.f32 %v182_v37, 1e-24 }
 0x257   :  { %270 = vrsqrt.f32 %v184_v38 }
 0x25d   :  { %v269_v39 = vpop.eup %268 }
 0x25e   :  { %v187_v40 = vmul.f32 %v269_v39, %v175_v29 }
 0x260   :  { %189 = vst [vmem:[#allocation7] sm:$0xff] %v187_v40 }
 0x261   :  { %v271_v41 = vpop.eup %270 }
 0x262   :  { %v188_v42 = vmul.f32 %v271_v41, %v176_v33 }
 0x264   :  { %190 = vst [vmem:[#allocation7 + $0x8] sm:$0xff] %v188_v42 }
 0x265   :  { %327 = shalt.err (!%p324_p6)
}
 0x266   :  { %s328_s17 = scalar_lea.hbm %s421_s3, 256 }
 0x267   :  { %p329_p7 = scmp.ne.s32.totalorder %s421_s3, %s328_s17  ;;  %p332_p8 = scmp.lt.u32.totalorder %s328_s17, %s421_s3 }
 0x269   :  { %p334_p9 = pnand %p332_p8, %p329_p7 }
 0x26b   :  { %337 = shalt.err (!%p334_p9)
}
 0x26c   :  { %202 = dma.vmem_to_hbm [thread:$0]  %s197_s13, 256, %s421_s3, [#allocation4], %s345_s22, %s345_s22, %s346_s23  }
 0x26d   :  { %342 = dma.done.wait [#allocation4], 256  }
 0x26e   :  { %343 = vsyncadd [#allocation4], 4294967040 }
 0x26f   :  { %206 = vsyncpa [#allocation3], 1 }
 0x270   :  { %207 = vsyncpa [#allocation6], 1 }
 0x271   :  { %208 = vsyncpa [#allocation4], 1 }

</bundles_post_ra>
